<compile_context>
chip_gen: v7x
topology: tpu7x:2x2x1
jax: 0.10.0
libtpu: 0.0.40
codegen_flags: <defaults>
</compile_context>

<pallas_src>
import jax
import jax.numpy as jnp
from jax.experimental import pallas as pl
from jax.experimental.pallas import tpu as pltpu


def _round_up(x, m):
    return (x + m - 1) // m * m


def _adapter_kernel(x_ref, w_ref, b_ref, o_ref):
    # x_ref: [TM, K], w_ref: [K, TN] (pre-transposed), b_ref: [1, TN], o_ref: [TM, TN]
    y = jnp.dot(x_ref[...], w_ref[...], preferred_element_type=jnp.float32)
    y = y + b_ref[...].astype(jnp.float32)     # bias broadcast over rows
    y = jnp.maximum(y, 0.0)                    # ReLU
    o_ref[...] = y.astype(o_ref.dtype)         # dropout(eval) == identity


def protein_adapter_forward(x, weight, bias, *, vmem_budget_bytes=40 * 1024 * 1024):
    """x: [..., input_dim]; weight: [output_dim, input_dim] (PyTorch layout);
    bias: [output_dim]. Returns [..., output_dim] (eval-mode forward)."""
    *lead, k = x.shape
    n = weight.shape[0]
    m = 1
    for d in lead:
        m *= d
    out_dtype = x.dtype
    if m == 0:
        return jnp.zeros((*lead, n), dtype=out_dtype)

    # One-time layout fix: [N, K] (PyTorch) -> [K, N] so N sits on the lane axis
    # inside the kernel. In a real model, store the weight pre-transposed.
    w_t = weight.T
    b2d = bias.reshape(1, n)
    x2d = x.reshape(m, k)

    x_bytes = jnp.dtype(x.dtype).itemsize
    w_bytes_e = jnp.dtype(w_t.dtype).itemsize
    b_bytes_e = jnp.dtype(bias.dtype).itemsize
    o_bytes = jnp.dtype(out_dtype).itemsize

    # --- VMEM accounting --------------------------------------------------
    # Physical layout: last dim -> 128 lanes, second-to-last -> 8 sublanes;
    # every pallas_call operand is double-buffered by default (2x everything).
    k_sub = _round_up(k, 8)
    k_lane = _round_up(k, 128)
    n_lane_full = _round_up(n, 128)

    full_w_tile2 = 2 * k_sub * n_lane_full * w_bytes_e      # double-buffered resident weight
    if full_w_tile2 <= vmem_budget_bytes // 2:
        tn = n                                               # weight stays fully resident
        n_lane = n_lane_full
    else:
        # Tile N in 128-lane multiples so large adapters don't collapse TM to 8.
        tn = max(128, (vmem_budget_bytes // 2) // (2 * k_sub * w_bytes_e) // 128 * 128)
        tn = int(min(tn, n_lane_full))
        n_lane = tn
        # TODO(synk): a K grid axis + f32 VMEM accumulator would be needed if even
        # a single 128-wide weight column block did not fit VMEM (huge input_dim).

    w_tile = k_sub * n_lane * w_bytes_e
    b_tile = 8 * n_lane * b_bytes_e
    x_row = k_lane * x_bytes
    o_row = n_lane * o_bytes

    # Rows per sublane depend on the activation dtype (f32 -> 8, bf16 -> 16, ...).
    tm_mult = 8 * max(1, 4 // x_bytes)
    budget_rows = (vmem_budget_bytes - 2 * (w_tile + b_tile)) // (2 * (x_row + o_row))
    tm = int(min(4096, max(tm_mult, budget_rows), _round_up(m, tm_mult)))
    tm = max(tm_mult, (tm // tm_mult) * tm_mult)

    grid = (pl.cdiv(m, tm), pl.cdiv(n, tn))

    footprint = 2 * (w_tile + b_tile + tm * (x_row + o_row))
    vmem_limit = int(min(max(footprint + (8 << 20), 32 << 20), 120 << 20))

    cost = pl.CostEstimate(
        flops=2 * m * k * n,
        transcendentals=0,
        bytes_accessed=(m * k * x_bytes            # x read
                        + k * n * w_bytes_e        # weight read
                        + n * b_bytes_e            # bias read
                        + m * n * o_bytes))        # out write

    out2d = pl.pallas_call(
        _adapter_kernel,
        out_shape=jax.ShapeDtypeStruct((m, n), out_dtype),
        grid=grid,
        in_specs=[
            pl.BlockSpec((tm, k), lambda i, j: (i, 0)),   # x tile marches over M
            pl.BlockSpec((k, tn), lambda i, j: (0, j)),   # weight resident / marches over N
            pl.BlockSpec((1, tn), lambda i, j: (0, j)),   # bias
        ],
        out_specs=pl.BlockSpec((tm, tn), lambda i, j: (i, j)),
        compiler_params=pltpu.CompilerParams(
            dimension_semantics=("parallel", "parallel"),  # shards across v7x's 2 TCs
            vmem_limit_bytes=vmem_limit),
        cost_estimate=cost,
    )(x2d, w_t, b2d)

    return out2d.reshape(*lead, n)


if __name__ == "__main__":
    key = jax.random.PRNGKey(0)
    kx, kw, kb = jax.random.split(key, 3)

    batch, seq, input_dim, output_dim = 2, 8, 32, 64

    x = jax.random.normal(kx, (batch, seq, input_dim), dtype=jnp.float32)
    # Deterministic parameter init (mimics nn.Linear's uniform range).
    bound = 1.0 / (input_dim ** 0.5)
    weight = jax.random.uniform(kw, (output_dim, input_dim),
                                minval=-bound, maxval=bound, dtype=jnp.float32)
    bias = jax.random.uniform(kb, (output_dim,),
                              minval=-bound, maxval=bound, dtype=jnp.float32)

    out = protein_adapter_forward(x, weight, bias)
    out = jax.block_until_ready(out)

    # Reference check in plain JAX (eval-mode: dropout == identity).
    ref = jnp.maximum(x @ weight.T + bias, 0.0)
    assert out.shape == (batch, seq, output_dim)
    assert jnp.allclose(out, ref, atol=1e-5, rtol=1e-5)

    print("KERNEL_OK")
</pallas_src>

<mosaic_0001>
module attributes {stable_mosaic.version = 11 : i64} {
  func.func @_adapter_kernel(%arg0: i32, %arg1: i32, %arg2: memref<16x32xf32, #tpu.memory_space<vmem>>, %arg3: memref<32x64xf32, #tpu.memory_space<vmem>>, %arg4: memref<1x64xf32, #tpu.memory_space<vmem>>, %arg5: memref<16x64xf32, #tpu.memory_space<vmem>>) attributes {dimension_semantics = [#tpu.dimension_semantics<parallel>, #tpu.dimension_semantics<parallel>], iteration_bounds = array<i64: 1, 1>, scalar_prefetch = 0 : i64, scratch_operands = 0 : i64, tpu.core_type = #tpu.core_type<tc>, window_params = [{transform_indices = @transform_0, window_bounds = array<i64: 16, 32>}, {transform_indices = @transform_1, window_bounds = array<i64: 32, 64>}, {transform_indices = @transform_2, window_bounds = array<i64: 1, 64>}, {transform_indices = @transform_3, window_bounds = array<i64: 16, 64>}]} {
    %c0 = arith.constant 0 : index
    %c0_0 = arith.constant 0 : index
    %0 = vector.load %arg2[%c0, %c0_0] : memref<16x32xf32, #tpu.memory_space<vmem>>, vector<16x32xf32>
    %c0_1 = arith.constant 0 : index
    %c0_2 = arith.constant 0 : index
    %1 = vector.load %arg3[%c0_1, %c0_2] : memref<32x64xf32, #tpu.memory_space<vmem>>, vector<32x64xf32>
    %cst = arith.constant dense<0.000000e+00> : vector<16x64xf32>
    %2 = tpu.matmul %0, %1, %cst {dimension_numbers = #tpu.dot_dimension_numbers<[1], [0], [0], [1], [0, 0, 1, 1], [], []>} : vector<16x32xf32>, vector<32x64xf32>, vector<16x64xf32> -> vector<16x64xf32>
    %c0_3 = arith.constant 0 : index
    %c0_4 = arith.constant 0 : index
    %3 = vector.load %arg4[%c0_3, %c0_4] : memref<1x64xf32, #tpu.memory_space<vmem>>, vector<1x64xf32>
    %4 = vector.broadcast %3 : vector<1x64xf32> to vector<16x64xf32>
    %5 = arith.addf %2, %4 : vector<16x64xf32>
    %cst_5 = arith.constant 0.000000e+00 : f32
    %6 = vector.broadcast %cst_5 : f32 to vector<16x64xf32>
    %7 = arith.maximumf %5, %6 : vector<16x64xf32>
    %c0_6 = arith.constant 0 : index
    %c0_7 = arith.constant 0 : index
    %8 = vector.load %arg5[%c0_6, %c0_7] : memref<16x64xf32, #tpu.memory_space<vmem>>, vector<16x64xf32>
    tpu.vector_store %arg5[%c0_6, %c0_7], %7 {strides = array<i32>} : memref<16x64xf32, #tpu.memory_space<vmem>>, vector<16x64xf32>,
    return
  }
  func.func @transform_0(%arg0: i32, %arg1: i32) -> (i32, i32) {
    %c0_i32 = arith.constant 0 : i32
    %c0_i32_0 = arith.constant 0 : i32
    return %arg0, %c0_i32 : i32, i32
  }
  func.func @transform_1(%arg0: i32, %arg1: i32) -> (i32, i32) {
    %c0_i32 = arith.constant 0 : i32
    %c0_i32_0 = arith.constant 0 : i32
    return %c0_i32, %arg1 : i32, i32
  }
  func.func @transform_2(%arg0: i32, %arg1: i32) -> (i32, i32) {
    %c0_i32 = arith.constant 0 : i32
    %c0_i32_0 = arith.constant 0 : i32
    return %c0_i32, %arg1 : i32, i32
  }
  func.func @transform_3(%arg0: i32, %arg1: i32) -> (i32, i32) {
    %c0_i32 = arith.constant 0 : i32
    return %arg0, %arg1 : i32, i32
  }
}

</mosaic_0001>

<bundles_post_ra>
// kernel: tpu_custom_call.1
= control target key start
LH: loop header
LB: loop body
LE: loop exit
PB: predicated region body
PF: predicated region fallthrough
CT: control target
= control target key end

     0   :  { %8 = vsyncpa [#allocation3], 0  ;;  %s339_s0 = inlined_call_operand.hbm [shape: f32[16,32], index: 0, kind: input, shape index: {}]   ;;  %s340_s1 = inlined_call_operand.hbm [shape: f32[32,64], index: 1, kind: input, shape index: {}]   ;;  %s341_s2 = inlined_call_operand.vmem [shape: f32[1,64], index: 2, kind: input, shape index: {}]   ;;  %s342_s3 = inlined_call_operand.hbm [shape: f32[16,64], index: 3, kind: output, shape index: {}]  }
   0x1   :  { %9 = vsyncpa [#allocation6], 0 }
   0x2   :  { %10 = vsyncpa [#allocation4], 0  ;;  %s266_s12 = smov [#allocation2]   ;;  %s194_s16 = scalar_lea.hbm %s339_s0, 256 }
   0x3   :  { %s16_s13 = sshll.u32 %s266_s12, 4  ;;  %p195_p0 = scmp.ne.s32.totalorder %s339_s0, %s194_s16  ;;  %s17_s13 = int_to_ptr.vmem [resolvable:$true] %s16_s13 }
   0x4   :  { %p198_p1 = scmp.lt.u32.totalorder %s194_s16, %s339_s0 }
   0x6   :  { %p200_p2 = pnand %p198_p1, %p195_p0 }
   0x8   :  { %203 = shalt.err (!%p200_p2)
}
   0x9   :  { %s204_s21 = scalar_lea.vmem %s17_s13, 256  ;;  %p209_p4 = scmp.lt.s32.totalorder %s17_s13, %s17_s13 }
   0xa   :  { %p205_p3 = scmp.ne.s32.totalorder %s17_s13, %s204_s21  ;;  %p210_p5 = scmp.lt.s32.totalorder %s204_s21, %s204_s21 }
   0xc   :  { %p211_p6 = por %p210_p5, %p209_p4 }
   0xe   :  { %p212_p7 = pnand %p211_p6, %p205_p3 }
  0x10   :  { %215 = shalt.err (!%p212_p7)
}
  0x11   :  { %s267_s22 = smov 128   ;;  %s268_s23 = smov 8  }
  0x12   :  { %22 = dma.hbm_to_vmem [thread:$0]  %s339_s0, 256, %s17_s13, [#allocation3], %s267_s22, %s267_s22, %s268_s23  }
  0x13   :  { %s269_s26 = smov [#allocation5]   ;;  %s216_s30 = scalar_lea.hbm %s340_s1, 512 }
  0x14   :  { %s28_s27 = sshll.u32 %s269_s26, 4  ;;  %p217_p8 = scmp.ne.s32.totalorder %s340_s1, %s216_s30  ;;  %s29_s27 = int_to_ptr.vmem [resolvable:$true] %s28_s27 }
  0x15   :  { %p220_p9 = scmp.lt.u32.totalorder %s216_s30, %s340_s1 }
  0x17   :  { %p222_p10 = pnand %p220_p9, %p217_p8 }
  0x19   :  { %225 = shalt.err (!%p222_p10)
}
  0x1a   :  { %s226_s8 = scalar_lea.vmem %s29_s27, 512  ;;  %p231_p12 = scmp.lt.s32.totalorder %s29_s27, %s29_s27 }
  0x1b   :  { %p227_p11 = scmp.ne.s32.totalorder %s29_s27, %s226_s8  ;;  %p232_p13 = scmp.lt.s32.totalorder %s226_s8, %s226_s8 }
  0x1d   :  { %p233_p0 = por %p232_p13, %p231_p12 }
  0x1f   :  { %p234_p1 = pnand %p233_p0, %p227_p11 }
  0x21   :  { %237 = shalt.err (!%p234_p1)
}
  0x22   :  { %34 = dma.hbm_to_vmem [thread:$0]  %s340_s1, 512, %s29_s27, [#allocation6], %s267_s22, %s267_s22, %s268_s23  }
  0x23   :  { %260 = dma.done.wait [#allocation3], 256  }
  0x24   :  { %261 = vsyncadd [#allocation3], 4294967040 }
  0x25   :  { %262 = dma.done.wait [#allocation6], 512  }
  0x26   :  { %263 = vsyncadd [#allocation6], 4294966784  ;;  %vm56_vm0 = vcmask 261120   ;;  %v45_v0 = vld [vmem:[#allocation5] sm:$0xff]  ;;  %v46_v1 = vld [vmem:[#allocation5 + $0x8] sm:$0xff]  ;;  %s270_s11 = smov [#allocation7]  }
  0x27   :  { %v47_v2 = vld [vmem:[#allocation5 + $0x10] sm:$0xff]  ;;  %v181_v3 = vpack.c.bf16 %v46_v1, %v45_v0  ;;  %v48_v4 = vld [vmem:[#allocation5 + $0x18] sm:$0xff]  ;;  %s148_s12 = sshll.u32 %s270_s11, 4  ;;  %vm140_vm1 = vcmask 523264   ;;  %s149_s12 = int_to_ptr.vmem [resolvable:$true] %s148_s12 }
  0x28   :  { %v43_v5 = vld [vmem:[#allocation2] sm:$0xff]  ;;  %v185_v6 = vpack.c.bf16 %v48_v4, %v47_v2  ;;  %v44_v7 = vld [vmem:[#allocation2 + $0x8] sm:$0xff]  ;;  %s238_s13 = scalar_lea.vmem %s149_s12, 256  ;;  %p243_p3 = scmp.lt.s32.totalorder %s149_s12, %s149_s12 }
  0x29   :  { %178 = vmatprep.mubr.msk.f32.mxu0 %vm56_vm0, %v43_v5  ;;  %182 = vmatprep.subr.bf16.mxu0 %v181_v3  ;;  %v161_v8 = vld [vmem:[%s341_s2] ss:$0 sm:$0xff]  ;;  %p239_p2 = scmp.ne.s32.totalorder %s149_s12, %s238_s13  ;;  %p244_p4 = scmp.lt.s32.totalorder %s238_s13, %s238_s13 }
  0x2a   :  { %184 = vmatpush3.bf16.msra.mxu0 %v181_v3 }
  0x2b   :  { %186 = vmatprep.subr.bf16.mxu0 %v185_v6  ;;  %p245_p5 = por %p244_p4, %p243_p3 }
  0x2d   :  { %p246_p6 = pnand %p245_p5, %p239_p2 }
  0x2e   :  { %188 = vmatpush3.bf16.msra.mxu0 %v185_v6 }
  0x31   :  { %179 = vmatmul.mubr.msk.f32.vlgmr.msra.gmra.mrb[0].mxu0 %vm56_vm0, %v44_v7 }
 0x104   :  { %v180_v9 = vpop.f32.mrb[0].mxu0 }
 0x105   :  { %v135_v10 = vadd.f32 %v180_v9, %v161_v8  ;;  %v129_v11 = vpop.f32.mrb[1].mxu0 }
 0x106   :  { %v130_v12 = vadd.f32 %v161_v8, %v129_v11 }
 0x107   :  { %v139_v13 = vmax.f32 %v135_v10, 0.0 }
 0x108   :  { %v138_v14 = vmax.f32 %v130_v12, 0.0 }
 0x109   :  { %142 = vst.msk [vmem:[#allocation7 + $0x8] sm:$0xff] %vm140_vm1, %v139_v13 }
 0x10a   :  { %141 = vst.msk [vmem:[#allocation7] sm:$0xff] %vm140_vm1, %v138_v14 }
 0x10b   :  { %249 = shalt.err (!%p246_p6)
}
 0x10c   :  { %s250_s15 = scalar_lea.hbm %s342_s3, 256 }
 0x10d   :  { %p251_p7 = scmp.ne.s32.totalorder %s342_s3, %s250_s15  ;;  %p254_p8 = scmp.lt.u32.totalorder %s250_s15, %s342_s3 }
 0x10f   :  { %p256_p9 = pnand %p254_p8, %p251_p7 }
 0x111   :  { %259 = shalt.err (!%p256_p9)
}
 0x112   :  { %154 = dma.vmem_to_hbm [thread:$0]  %s149_s12, 256, %s342_s3, [#allocation4], %s267_s22, %s267_s22, %s268_s23  }
 0x113   :  { %264 = dma.done.wait [#allocation4], 256  }
 0x114   :  { %265 = vsyncadd [#allocation4], 4294967040 }
 0x115   :  { %158 = vsyncpa [#allocation3], 1 }
 0x116   :  { %159 = vsyncpa [#allocation6], 1 }
 0x117   :  { %160 = vsyncpa [#allocation4], 1 }

</bundles_post_ra>
